<compile_context>
chip_gen: v7x
topology: tpu7x:2x2x1
jax: 0.10.0
libtpu: 0.0.40
codegen_flags: <defaults>
</compile_context>

<pallas_src>
import functools

import jax
import jax.numpy as jnp
from jax import lax
from jax.experimental import pallas as pl
from jax.experimental.pallas import tpu as pltpu

_NEG_INF = float("-inf")
_F32 = jnp.float32
_BF16 = jnp.bfloat16


# --------------------------------------------------------------------------
# helpers
# --------------------------------------------------------------------------
def _const_idx(*_):
    return (0, 0)


def _resident_spec(shape, single_buffer):
    """BlockSpec for a grid-constant (VMEM-resident) operand."""
    if single_buffer:
        # Constant block index -> no refetch; single-buffer to halve its VMEM.
        return pl.BlockSpec(shape, _const_idx, pipeline_mode=pl.Buffered(1))
    return pl.BlockSpec(shape, _const_idx)


def _vmem_limit_bytes():
    """3/4 of the per-core VMEM capacity (generation-aware, safe fallback)."""
    try:
        cap = int(pltpu.get_tpu_info().vmem_capacity_bytes)
    except Exception:
        kind = jax.devices()[0].device_kind.lower()
        cap = (64 if ("v7" in kind or "7x" in kind) else 128) * 1024 * 1024
    return (cap * 3) // 4


def _use_bf16_exp():
    """bf16 EUP exp only on v6e / v7x (v5e and older have no bf16 EUP)."""
    kind = jax.devices()[0].device_kind.lower()
    return any(tag in kind for tag in ("v6", "v7", "7x"))


def _pick_q_tile(n, cap=256):
    """Largest query tile <= cap that divides n, preferring >= 2 tiles (v7x)."""
    cands = [c for c in (256, 128, 64, 32, 16, 8) if c <= cap and n % c == 0]
    for c in cands:
        if n // c >= 2:
            return c
    return cands[0] if cands else n


def _pick_kv_tile(n, cap=512):
    """kv tile must be a multiple of 128 (mask lane dim) or the full extent."""
    for c in (512, 256, 128):
        if c <= cap and n % c == 0:
            return c
    return n


def _pick_row_tile(n, cap=512):
    for c in (512, 256, 128, 64, 32, 16, 8):
        if c <= cap and n % c == 0:
            return c
    return n


# --------------------------------------------------------------------------
# projection kernels (run once; hoisted out of the attention kv loop)
# --------------------------------------------------------------------------
def _proj_q_kernel(x_ref, wT_ref, b_ref, o_ref, *, nh, dh):
    y = jnp.dot(x_ref[...], wT_ref[...], preferred_element_type=_F32) + b_ref[...]
    for h in range(nh):                        # head-major relayout, once per row tile
        o_ref[h] = y[:, h * dh:(h + 1) * dh].astype(o_ref.dtype)


def _proj_kv_kernel(x_ref, wkT_ref, bk_ref, wvT_ref, bv_ref, k_ref, v_ref, *, nh, dh):
    x = x_ref[...]
    kf = jnp.dot(x, wkT_ref[...], preferred_element_type=_F32) + bk_ref[...]
    vf = jnp.dot(x, wvT_ref[...], preferred_element_type=_F32) + bv_ref[...]
    for h in range(nh):
        sl = slice(h * dh, (h + 1) * dh)
        k_ref[h] = kf[:, sl].astype(k_ref.dtype)
        v_ref[h] = vf[:, sl].astype(v_ref.dtype)


def _project_q(x, wT, b, *, nh, dh, vmem_limit, single_buffer):
    n, H = x.shape
    tile = _pick_row_tile(n)
    grid_spec = pltpu.PrefetchScalarGridSpec(
        num_scalar_prefetch=0,
        grid=(n // tile,),
        in_specs=[pl.BlockSpec((tile, H), lambda i: (i, 0)),
                  _resident_spec((H, H), single_buffer),
                  _resident_spec((1, H), single_buffer)],
        out_specs=pl.BlockSpec((nh, tile, dh), lambda i: (0, i, 0)),
    )
    return pl.pallas_call(
        functools.partial(_proj_q_kernel, nh=nh, dh=dh),
        grid_spec=grid_spec,
        out_shape=jax.ShapeDtypeStruct((nh, n, dh), _BF16),
        compiler_params=pltpu.CompilerParams(
            dimension_semantics=("parallel",),
            vmem_limit_bytes=vmem_limit),
    )(x, wT, b)


def _project_kv(x, wkT, bk, wvT, bv, *, nh, dh, vmem_limit, single_buffer):
    n, H = x.shape
    tile = _pick_row_tile(n)
    out_spec = pl.BlockSpec((nh, tile, dh), lambda i: (0, i, 0))
    grid_spec = pltpu.PrefetchScalarGridSpec(
        num_scalar_prefetch=0,
        grid=(n // tile,),
        in_specs=[pl.BlockSpec((tile, H), lambda i: (i, 0)),
                  _resident_spec((H, H), single_buffer),
                  _resident_spec((1, H), single_buffer),
                  _resident_spec((H, H), single_buffer),
                  _resident_spec((1, H), single_buffer)],
        out_specs=[out_spec, out_spec],
    )
    return pl.pallas_call(
        functools.partial(_proj_kv_kernel, nh=nh, dh=dh),
        grid_spec=grid_spec,
        out_shape=(jax.ShapeDtypeStruct((nh, n, dh), _BF16),
                   jax.ShapeDtypeStruct((nh, n, dh), _BF16)),
        compiler_params=pltpu.CompilerParams(
            dimension_semantics=("parallel",),
            vmem_limit_bytes=vmem_limit),
    )(x, wkT, bk, wvT, bv)


# --------------------------------------------------------------------------
# attention kernel (online softmax over kv tiles, block-sparse skip)
# --------------------------------------------------------------------------
def _attn_kernel(flags_ref, effi_ref, effj_ref,
                 q_ref, k_ref, v_ref, woT_ref, bo_ref, *rest,
                 nk, num_heads, head_dim, has_mask, bf16_exp):
    del effi_ref, effj_ref                     # consumed by index_maps only
    if has_mask:
        mask_ref, rest = rest[0], rest[1:]
    out_ref, m_sc, l_sc, acc_sc, o_sc = rest

    i = pl.program_id(0)                       # query-tile index ("parallel")
    j = pl.program_id(1)                       # kv-tile index (reduction, last)
    nh, dh = num_heads, head_dim

    @pl.when(j == 0)
    def _init():
        m_sc[...] = jnp.full_like(m_sc, _NEG_INF)
        l_sc[...] = jnp.zeros_like(l_sc)
        acc_sc[...] = jnp.zeros_like(acc_sc)

    def _update():
        # Scores batched over heads: (nh, TQ, TK), f32 accumulate on MXU.
        s = jnp.einsum("hqd,hkd->hqk", q_ref[...], k_ref[...],
                       preferred_element_type=_F32)
        if has_mask:
            # Batch masks are {0,1}: pure select, no mask*score multiply.
            keep = (mask_ref[...] != 0)[None, :, :]
            s = jnp.where(keep, s, _NEG_INF)

        m_prev = m_sc[...]
        m_new = jnp.maximum(m_prev, jnp.max(s, axis=-1, keepdims=True))
        # Guard fully-masked rows so exp never sees (-inf) - (-inf) = NaN.
        m_safe = jnp.where(m_new == _NEG_INF, 0.0, m_new)
        alpha = jnp.exp(m_prev - m_safe)
        if bf16_exp:                            # v6e/v7x: bf16 EUP, 2x exp rate
            p = jnp.exp((s - m_safe).astype(_BF16))
            p_sum = jnp.sum(p.astype(_F32), axis=-1, keepdims=True)
        else:                                   # v5e: no bf16 EUP — stay f32
            p32 = jnp.exp(s - m_safe)
            p_sum = jnp.sum(p32, axis=-1, keepdims=True)
            p = p32.astype(_BF16)
        l_sc[...] = alpha * l_sc[...] + p_sum
        acc_sc[...] = alpha * acc_sc[...] + jnp.einsum(
            "hqk,hkd->hqd", p, v_ref[...], preferred_element_type=_F32)
        m_sc[...] = m_new

    if has_mask:
        # Skip all-zero batch-mask tiles entirely (their DMA is also elided
        # via the effective-block-index index_maps in the wrapper).
        pl.when(flags_ref[i * nk + j] != 0)(_update)
    else:
        _update()

    @pl.when(j == pl.num_programs(1) - 1)
    def _finalize():
        l = l_sc[...]
        # Fully-masked query rows have l == 0: output 0 (ref would be NaN).
        inv_l = pl.reciprocal(jnp.where(l > 0.0, l, 1.0), approx=True)
        o = acc_sc[...] * inv_l                 # (nh, TQ, dh) f32
        for h in range(nh):                     # merge heads at lane offsets
            o_sc[:, h * dh:(h + 1) * dh] = o[h].astype(o_sc.dtype)
        out = jnp.dot(o_sc[...], woT_ref[...],
                      preferred_element_type=_F32) + bo_ref[...]
        out_ref[...] = out.astype(out_ref.dtype)


# --------------------------------------------------------------------------
# public forward
# --------------------------------------------------------------------------
def init_params(key, hidden_size, num_heads, gain=0.7071):
    """Xavier-uniform weights (as in reset_parameters), default Linear biases."""
    keys = jax.random.split(key, 8)
    wbound = gain * (6.0 / (hidden_size + hidden_size)) ** 0.5
    bbound = 1.0 / (hidden_size ** 0.5)

    def w(k):
        return jax.random.uniform(k, (hidden_size, hidden_size), _F32, -wbound, wbound)

    def b(k):
        return jax.random.uniform(k, (hidden_size,), _F32, -bbound, bbound)

    return dict(num_heads=num_heads,
                wq=w(keys[0]), bq=b(keys[1]), wk=w(keys[2]), bk=b(keys[3]),
                wv=w(keys[4]), bv=b(keys[5]), wo=w(keys[6]), bo=b(keys[7]))


def _forward_impl(params, h_target, h_source, batch_mask, tile_q, tile_k,
                  single_buffer):
    nt, H = h_target.shape
    ns = h_source.shape[0]
    nh = int(params["num_heads"])
    dh = H // nh
    scale = dh ** (-0.5)

    tq = tile_q or _pick_q_tile(nt)
    tk = tile_k or _pick_kv_tile(ns)
    assert nt % tq == 0 and ns % tk == 0, "tile sizes must divide n_target/n_source"
    nq, nk = nt // tq, ns // tk

    vmem_limit = _vmem_limit_bytes()
    bf16_exp = _use_bf16_exp()

    # perm[h*dh + d] = d*nh + h : maps the PyTorch reshape(n, dh, nh) hidden
    # layout (head index fastest) to contiguous head-major lane blocks.
    perm = jnp.array([d * nh + h for h in range(nh) for d in range(dh)],
                     dtype=jnp.int32)

    # Pre-transposed, head-permuted weights; softmax scale folded into Q.
    wqT = (scale * params["wq"][perm, :]).T.astype(_BF16)
    bq = (scale * params["bq"][perm])[None, :].astype(_F32)
    wkT = params["wk"][perm, :].T.astype(_BF16)
    bk = params["bk"][perm][None, :].astype(_F32)
    wvT = params["wv"][perm, :].T.astype(_BF16)
    bv = params["bv"][perm][None, :].astype(_F32)
    woT = params["wo"][:, perm].T.astype(_BF16)
    bo = params["bo"][None, :].astype(_F32)

    ht = h_target.astype(_BF16)
    hs = h_source.astype(_BF16)

    # Q/K/V projections computed exactly once (hoisted out of the kv loop),
    # emitted head-major (nh, n, dh) in bf16, ready to stream into attention.
    q3 = _project_q(ht, wqT, bq, nh=nh, dh=dh,
                    vmem_limit=vmem_limit, single_buffer=single_buffer)
    k3, v3 = _project_kv(hs, wkT, bk, wvT, bv, nh=nh, dh=dh,
                         vmem_limit=vmem_limit, single_buffer=single_buffer)

    has_mask = batch_mask is not None
    T = nq * nk
    t_idx = jnp.arange(T, dtype=jnp.int32)
    if has_mask:
        nz = (batch_mask.reshape(nq, tq, nk, tk) != 0).any(axis=(1, 3))
        flags = nz.reshape(-1).astype(jnp.int32)          # 1-D: avoids SMEM padding
        # Forward-fill the last fetched block index along the flattened grid
        # order so skipped tiles return the previous index => DMA is elided.
        last_nz = jnp.maximum(lax.cummax(jnp.where(flags > 0, t_idx, -1), axis=0), 0)
        eff_i = (last_nz // nk).astype(jnp.int32)
        eff_j = (last_nz % nk).astype(jnp.int32)
        # {0,1} batch mask shipped as int8 (4x less DMA than f32).
        mask_i8 = (batch_mask != 0).astype(jnp.int8)
    else:
        flags = jnp.ones((T,), jnp.int32)
        eff_i = (t_idx // nk).astype(jnp.int32)
        eff_j = (t_idx % nk).astype(jnp.int32)
        mask_i8 = None

    def q_map(i, j, fl, ei, ej):
        return (0, i, 0)

    def kv_map(i, j, fl, ei, ej):
        return (0, ej[i * nk + j], 0)

    def mask_map(i, j, fl, ei, ej):
        t = i * nk + j
        return (ei[t], ej[t])

    def out_map(i, j, fl, ei, ej):
        return (i, 0)

    in_specs = [
        pl.BlockSpec((nh, tq, dh), q_map),                 # Q tile (per i)
        pl.BlockSpec((nh, tk, dh), kv_map),                # K tile (elided if skipped)
        pl.BlockSpec((nh, tk, dh), kv_map),                # V tile
        _resident_spec((H, H), single_buffer),             # out-proj weight
        _resident_spec((1, H), single_buffer),             # out-proj bias
    ]
    args = [q3, k3, v3, woT, bo]
    if has_mask:
        in_specs.append(pl.BlockSpec((tq, tk), mask_map))  # int8 mask tile
        args.append(mask_i8)

    kernel = functools.partial(_attn_kernel, nk=nk, num_heads=nh, head_dim=dh,
                               has_mask=has_mask, bf16_exp=bf16_exp)

    grid_spec = pltpu.PrefetchScalarGridSpec(
        num_scalar_prefetch=3,
        grid=(nq, nk),
        in_specs=in_specs,
        out_specs=pl.BlockSpec((tq, H), out_map),
        scratch_shapes=[
            pltpu.VMEM((nh, tq, 1), _F32),    # running max
            pltpu.VMEM((nh, tq, 1), _F32),    # running denom
            pltpu.VMEM((nh, tq, dh), _F32),   # PV accumulator
            pltpu.VMEM((tq, H), _BF16),       # head-merge staging (bf16)
        ],
    )

    return pl.pallas_call(
        kernel,
        grid_spec=grid_spec,
        out_shape=jax.ShapeDtypeStruct((nt, H), h_target.dtype),
        compiler_params=pltpu.CompilerParams(
            dimension_semantics=("parallel", "arbitrary"),
            vmem_limit_bytes=vmem_limit),
    )(flags, eff_i, eff_j, *args)


def sparse_mha_forward(params, h_target, h_source, batch_mask=None,
                       tile_q=None, tile_k=None):
    try:
        return _forward_impl(params, h_target, h_source, batch_mask,
                             tile_q, tile_k, single_buffer=True)
    except Exception:
        # pl.Buffered(1) (single-buffered resident weights) unsupported on this
        # jax/libtpu combination -> retry with default double-buffering.
        return _forward_impl(params, h_target, h_source, batch_mask,
                             tile_q, tile_k, single_buffer=False)


def reference_forward(params, h_target, h_source, batch_mask=None):
    """Plain-JAX f32 mirror of the PyTorch module (NO_MASK, {0,1} batch mask)."""
    nt, H = h_target.shape
    ns = h_source.shape[0]
    nh = params["num_heads"]
    dh = H // nh
    scale = dh ** (-0.5)
    q = (h_target @ params["wq"].T + params["bq"]).reshape(nt, dh, nh) * scale
    k = (h_source @ params["wk"].T + params["bk"]).reshape(ns, dh, nh)
    v = (h_source @ params["wv"].T + params["bv"]).reshape(ns, dh, nh)
    s = jnp.einsum("tdh,sdh->tsh", q, k)
    if batch_mask is not None:
        s = jnp.where(batch_mask[:, :, None] != 0, s, -jnp.inf)
    p = jax.nn.softmax(s, axis=1)
    o = jnp.einsum("tsh,sdh->tdh", p, v)
    return o.reshape(nt, H) @ params["wo"].T + params["bo"]


if __name__ == "__main__":
    hidden_size = 32
    num_heads = 4
    n_target = 32
    n_source = 256

    key = jax.random.PRNGKey(0)
    kp, kt, ks = jax.random.split(key, 3)
    params = init_params(kp, hidden_size, num_heads)
    h_target = jax.random.normal(kt, (n_target, hidden_size), jnp.float32)
    h_source = jax.random.normal(ks, (n_source, hidden_size), jnp.float32)

    # Block-diagonal batch mask (2 batches): with tile_k=128 half of the
    # (q_tile, kv_tile) pairs are all-zero, exercising the block-skip +
    # DMA-elision path.
    ids_t = (jnp.arange(n_target) // (n_target // 2))[:, None]
    ids_s = (jnp.arange(n_source) // (n_source // 2))[None, :]
    batch_mask = (ids_t == ids_s).astype(jnp.float32)

    out = jax.block_until_ready(
        sparse_mha_forward(params, h_target, h_source, batch_mask, tile_k=128))
    ref = reference_forward(params, h_target, h_source, batch_mask)
    assert out.shape == (n_target, hidden_size)
    assert bool(jnp.all(jnp.isfinite(out)))
    err = float(jnp.max(jnp.abs(out - ref)))
    assert jnp.allclose(out, ref, atol=3e-2, rtol=3e-2), err

    # No-mask path (dense attention, mask skipped at trace time) must match too.
    out_nm = jax.block_until_ready(
        sparse_mha_forward(params, h_target, h_source, None))
    ref_nm = reference_forward(params, h_target, h_source, None)
    err_nm = float(jnp.max(jnp.abs(out_nm - ref_nm)))
    assert jnp.allclose(out_nm, ref_nm, atol=3e-2, rtol=3e-2), err_nm

    print("KERNEL_OK")
</pallas_src>

<mosaic_0001>
module attributes {stable_mosaic.version = 11 : i64} {
  func.func @_proj_q_kernel(%arg0: i32, %arg1: memref<32x32xbf16, #tpu.memory_space<vmem>>, %arg2: memref<32x32xbf16, #tpu.memory_space<vmem>>, %arg3: memref<1x32xf32, #tpu.memory_space<vmem>>, %arg4: memref<4x32x8xbf16, #tpu.memory_space<vmem>>) attributes {dimension_semantics = [#tpu.dimension_semantics<parallel>], iteration_bounds = array<i64: 1>, scalar_prefetch = 0 : i64, scratch_operands = 0 : i64, tpu.core_type = #tpu.core_type<tc>, window_params = [{transform_indices = @transform_0, window_bounds = array<i64: 32, 32>}, {pipeline_mode = #tpu.pipeline_mode<synchronous>, transform_indices = @transform_1, window_bounds = array<i64: 32, 32>}, {pipeline_mode = #tpu.pipeline_mode<synchronous>, transform_indices = @transform_2, window_bounds = array<i64: 1, 32>}, {transform_indices = @transform_3, window_bounds = array<i64: 4, 32, 8>}]} {
    %c0 = arith.constant 0 : index
    %c0_0 = arith.constant 0 : index
    %0 = vector.load %arg1[%c0, %c0_0] : memref<32x32xbf16, #tpu.memory_space<vmem>>, vector<32x32xbf16>
    %c0_1 = arith.constant 0 : index
    %c0_2 = arith.constant 0 : index
    %1 = vector.load %arg2[%c0_1, %c0_2] : memref<32x32xbf16, #tpu.memory_space<vmem>>, vector<32x32xbf16>
    %cst = arith.constant dense<0.000000e+00> : vector<32x32xf32>
    %2 = tpu.matmul %0, %1, %cst {dimension_numbers = #tpu.dot_dimension_numbers<[1], [0], [0], [1], [0, 0, 1, 1], [], []>} : vector<32x32xbf16>, vector<32x32xbf16>, vector<32x32xf32> -> vector<32x32xf32>
    %c0_3 = arith.constant 0 : index
    %c0_4 = arith.constant 0 : index
    %3 = vector.load %arg3[%c0_3, %c0_4] : memref<1x32xf32, #tpu.memory_space<vmem>>, vector<1x32xf32>
    %4 = vector.broadcast %3 : vector<1x32xf32> to vector<32x32xf32>
    %5 = arith.addf %2, %4 : vector<32x32xf32>
    %6 = vector.extract_strided_slice %5 {offsets = [0, 0], sizes = [32, 8], strides = [1, 1]} : vector<32x32xf32> to vector<32x8xf32>
    %7 = arith.truncf %6 : vector<32x8xf32> to vector<32x8xbf16>
    %c0_5 = arith.constant 0 : index
    %c0_6 = arith.constant 0 : index
    %c0_7 = arith.constant 0 : index
    %8 = vector.load %arg4[%c0_5, %c0_6, %c0_7] : memref<4x32x8xbf16, #tpu.memory_space<vmem>>, vector<1x32x8xbf16>
    %9 = vector.shape_cast %8 : vector<1x32x8xbf16> to vector<32x8xbf16>
    %10 = vector.shape_cast %7 : vector<32x8xbf16> to vector<1x32x8xbf16>
    tpu.vector_store %arg4[%c0_5, %c0_6, %c0_7], %10 {strides = array<i32>} : memref<4x32x8xbf16, #tpu.memory_space<vmem>>, vector<1x32x8xbf16>,
    %11 = vector.extract_strided_slice %5 {offsets = [0, 8], sizes = [32, 8], strides = [1, 1]} : vector<32x32xf32> to vector<32x8xf32>
    %12 = arith.truncf %11 : vector<32x8xf32> to vector<32x8xbf16>
    %c1 = arith.constant 1 : index
    %c0_8 = arith.constant 0 : index
    %c0_9 = arith.constant 0 : index
    %13 = vector.load %arg4[%c1, %c0_8, %c0_9] : memref<4x32x8xbf16, #tpu.memory_space<vmem>>, vector<1x32x8xbf16>
    %14 = vector.shape_cast %13 : vector<1x32x8xbf16> to vector<32x8xbf16>
    %15 = vector.shape_cast %12 : vector<32x8xbf16> to vector<1x32x8xbf16>
    tpu.vector_store %arg4[%c1, %c0_8, %c0_9], %15 {strides = array<i32>} : memref<4x32x8xbf16, #tpu.memory_space<vmem>>, vector<1x32x8xbf16>,
    %16 = vector.extract_strided_slice %5 {offsets = [0, 16], sizes = [32, 8], strides = [1, 1]} : vector<32x32xf32> to vector<32x8xf32>
    %17 = arith.truncf %16 : vector<32x8xf32> to vector<32x8xbf16>
    %c2 = arith.constant 2 : index
    %c0_10 = arith.constant 0 : index
    %c0_11 = arith.constant 0 : index
    %18 = vector.load %arg4[%c2, %c0_10, %c0_11] : memref<4x32x8xbf16, #tpu.memory_space<vmem>>, vector<1x32x8xbf16>
    %19 = vector.shape_cast %18 : vector<1x32x8xbf16> to vector<32x8xbf16>
    %20 = vector.shape_cast %17 : vector<32x8xbf16> to vector<1x32x8xbf16>
    tpu.vector_store %arg4[%c2, %c0_10, %c0_11], %20 {strides = array<i32>} : memref<4x32x8xbf16, #tpu.memory_space<vmem>>, vector<1x32x8xbf16>,
    %21 = vector.extract_strided_slice %5 {offsets = [0, 24], sizes = [32, 8], strides = [1, 1]} : vector<32x32xf32> to vector<32x8xf32>
    %22 = arith.truncf %21 : vector<32x8xf32> to vector<32x8xbf16>
    %c3 = arith.constant 3 : index
    %c0_12 = arith.constant 0 : index
    %c0_13 = arith.constant 0 : index
    %23 = vector.load %arg4[%c3, %c0_12, %c0_13] : memref<4x32x8xbf16, #tpu.memory_space<vmem>>, vector<1x32x8xbf16>
    %24 = vector.shape_cast %23 : vector<1x32x8xbf16> to vector<32x8xbf16>
    %25 = vector.shape_cast %22 : vector<32x8xbf16> to vector<1x32x8xbf16>
    tpu.vector_store %arg4[%c3, %c0_12, %c0_13], %25 {strides = array<i32>} : memref<4x32x8xbf16, #tpu.memory_space<vmem>>, vector<1x32x8xbf16>,
    return
  }
  func.func @transform_0(%arg0: i32) -> (i32, i32) {
    %c0_i32 = arith.constant 0 : i32
    %c0_i32_0 = arith.constant 0 : i32
    return %arg0, %c0_i32 : i32, i32
  }
  func.func @transform_1(%arg0: i32) -> (i32, i32) {
    %c0_i32 = arith.constant 0 : i32
    %c0_i32_0 = arith.constant 0 : i32
    %c0_i32_1 = arith.constant 0 : i32
    return %c0_i32, %c0_i32_0 : i32, i32
  }
  func.func @transform_2(%arg0: i32) -> (i32, i32) {
    %c0_i32 = arith.constant 0 : i32
    %c0_i32_0 = arith.constant 0 : i32
    %c0_i32_1 = arith.constant 0 : i32
    return %c0_i32, %c0_i32_0 : i32, i32
  }
  func.func @transform_3(%arg0: i32) -> (i32, i32, i32) {
    %c0_i32 = arith.constant 0 : i32
    %c0_i32_0 = arith.constant 0 : i32
    %c0_i32_1 = arith.constant 0 : i32
    return %c0_i32, %arg0, %c0_i32_0 : i32, i32, i32
  }
}

module attributes {stable_mosaic.version = 11 : i64} {
  func.func @_proj_q_kernel(%arg0: i32, %arg1: memref<32x32xbf16, #tpu.memory_space<vmem>>, %arg2: memref<32x32xbf16, #tpu.memory_space<vmem>>, %arg3: memref<1x32xf32, #tpu.memory_space<vmem>>, %arg4: memref<4x32x8xbf16, #tpu.memory_space<vmem>>) attributes {dimension_semantics = [#tpu.dimension_semantics<parallel>], iteration_bounds = array<i64: 1>, scalar_prefetch = 0 : i64, scratch_operands = 0 : i64, tpu.core_type = #tpu.core_type<tc>, window_params = [{transform_indices = @transform_0, window_bounds = array<i64: 32, 32>}, {pipeline_mode = #tpu.pipeline_mode<synchronous>, transform_indices = @transform_1, window_bounds = array<i64: 32, 32>}, {pipeline_mode = #tpu.pipeline_mode<synchronous>, transform_indices = @transform_2, window_bounds = array<i64: 1, 32>}, {transform_indices = @transform_3, window_bounds = array<i64: 4, 32, 8>}]} {
    %c0 = arith.constant 0 : index
    %c0_0 = arith.constant 0 : index
    %0 = vector.load %arg1[%c0, %c0_0] : memref<32x32xbf16, #tpu.memory_space<vmem>>, vector<32x32xbf16>
    %c0_1 = arith.constant 0 : index
    %c0_2 = arith.constant 0 : index
    %1 = vector.load %arg2[%c0_1, %c0_2] : memref<32x32xbf16, #tpu.memory_space<vmem>>, vector<32x32xbf16>
    %cst = arith.constant dense<0.000000e+00> : vector<32x32xf32>
    %2 = tpu.matmul %0, %1, %cst {dimension_numbers = #tpu.dot_dimension_numbers<[1], [0], [0], [1], [0, 0, 1, 1], [], []>} : vector<32x32xbf16>, vector<32x32xbf16>, vector<32x32xf32> -> vector<32x32xf32>
    %c0_3 = arith.constant 0 : index
    %c0_4 = arith.constant 0 : index
    %3 = vector.load %arg3[%c0_3, %c0_4] : memref<1x32xf32, #tpu.memory_space<vmem>>, vector<1x32xf32>
    %4 = vector.broadcast %3 : vector<1x32xf32> to vector<32x32xf32>
    %5 = arith.addf %2, %4 : vector<32x32xf32>
    %6 = vector.extract_strided_slice %5 {offsets = [0, 0], sizes = [32, 8], strides = [1, 1]} : vector<32x32xf32> to vector<32x8xf32>
    %7 = arith.truncf %6 : vector<32x8xf32> to vector<32x8xbf16>
    %c0_5 = arith.constant 0 : index
    %c0_6 = arith.constant 0 : index
    %c0_7 = arith.constant 0 : index
    %8 = vector.load %arg4[%c0_5, %c0_6, %c0_7] : memref<4x32x8xbf16, #tpu.memory_space<vmem>>, vector<1x32x8xbf16>
    %9 = vector.shape_cast %8 : vector<1x32x8xbf16> to vector<32x8xbf16>
    %10 = vector.shape_cast %7 : vector<32x8xbf16> to vector<1x32x8xbf16>
    tpu.vector_store %arg4[%c0_5, %c0_6, %c0_7], %10 {strides = array<i32>} : memref<4x32x8xbf16, #tpu.memory_space<vmem>>, vector<1x32x8xbf16>,
    %11 = vector.extract_strided_slice %5 {offsets = [0, 8], sizes = [32, 8], strides = [1, 1]} : vector<32x32xf32> to vector<32x8xf32>
    %12 = arith.truncf %11 : vector<32x8xf32> to vector<32x8xbf16>
    %c1 = arith.constant 1 : index
    %c0_8 = arith.constant 0 : index
    %c0_9 = arith.constant 0 : index
    %13 = vector.load %arg4[%c1, %c0_8, %c0_9] : memref<4x32x8xbf16, #tpu.memory_space<vmem>>, vector<1x32x8xbf16>
    %14 = vector.shape_cast %13 : vector<1x32x8xbf16> to vector<32x8xbf16>
    %15 = vector.shape_cast %12 : vector<32x8xbf16> to vector<1x32x8xbf16>
    tpu.vector_store %arg4[%c1, %c0_8, %c0_9], %15 {strides = array<i32>} : memref<4x32x8xbf16, #tpu.memory_space<vmem>>, vector<1x32x8xbf16>,
    %16 = vector.extract_strided_slice %5 {offsets = [0, 16], sizes = [32, 8], strides = [1, 1]} : vector<32x32xf32> to vector<32x8xf32>
    %17 = arith.truncf %16 : vector<32x8xf32> to vector<32x8xbf16>
    %c2 = arith.constant 2 : index
    %c0_10 = arith.constant 0 : index
    %c0_11 = arith.constant 0 : index
    %18 = vector.load %arg4[%c2, %c0_10, %c0_11] : memref<4x32x8xbf16, #tpu.memory_space<vmem>>, vector<1x32x8xbf16>
    %19 = vector.shape_cast %18 : vector<1x32x8xbf16> to vector<32x8xbf16>
    %20 = vector.shape_cast %17 : vector<32x8xbf16> to vector<1x32x8xbf16>
    tpu.vector_store %arg4[%c2, %c0_10, %c0_11], %20 {strides = array<i32>} : memref<4x32x8xbf16, #tpu.memory_space<vmem>>, vector<1x32x8xbf16>,
    %21 = vector.extract_strided_slice %5 {offsets = [0, 24], sizes = [32, 8], strides = [1, 1]} : vector<32x32xf32> to vector<32x8xf32>
    %22 = arith.truncf %21 : vector<32x8xf32> to vector<32x8xbf16>
    %c3 = arith.constant 3 : index
    %c0_12 = arith.constant 0 : index
    %c0_13 = arith.constant 0 : index
    %23 = vector.load %arg4[%c3, %c0_12, %c0_13] : memref<4x32x8xbf16, #tpu.memory_space<vmem>>, vector<1x32x8xbf16>
    %24 = vector.shape_cast %23 : vector<1x32x8xbf16> to vector<32x8xbf16>
    %25 = vector.shape_cast %22 : vector<32x8xbf16> to vector<1x32x8xbf16>
    tpu.vector_store %arg4[%c3, %c0_12, %c0_13], %25 {strides = array<i32>} : memref<4x32x8xbf16, #tpu.memory_space<vmem>>, vector<1x32x8xbf16>,
    return
  }
  func.func @transform_0(%arg0: i32) -> (i32, i32) {
    %c0_i32 = arith.constant 0 : i32
    %c0_i32_0 = arith.constant 0 : i32
    return %arg0, %c0_i32 : i32, i32
  }
  func.func @transform_1(%arg0: i32) -> (i32, i32) {
    %c0_i32 = arith.constant 0 : i32
    %c0_i32_0 = arith.constant 0 : i32
    %c0_i32_1 = arith.constant 0 : i32
    return %c0_i32, %c0_i32_0 : i32, i32
  }
  func.func @transform_2(%arg0: i32) -> (i32, i32) {
    %c0_i32 = arith.constant 0 : i32
    %c0_i32_0 = arith.constant 0 : i32
    %c0_i32_1 = arith.constant 0 : i32
    return %c0_i32, %c0_i32_0 : i32, i32
  }
  func.func @transform_3(%arg0: i32) -> (i32, i32, i32) {
    %c0_i32 = arith.constant 0 : i32
    %c0_i32_0 = arith.constant 0 : i32
    %c0_i32_1 = arith.constant 0 : i32
    return %c0_i32, %arg0, %c0_i32_0 : i32, i32, i32
  }
}

</mosaic_0001>

<bundles_post_ra>
// kernel: tpu_custom_call.1
= control target key start
LH: loop header
LB: loop body
LE: loop exit
PB: predicated region body
PF: predicated region fallthrough
CT: control target
= control target key end

     0   :  { %8 = vsyncpa [#allocation3], 0  ;;  %s481_s0 = inlined_call_operand.hbm [shape: bf16[32,32], index: 0, kind: input, shape index: {}]   ;;  %s482_s1 = inlined_call_operand.hbm [shape: bf16[32,32], index: 1, kind: input, shape index: {}]   ;;  %s483_s2 = inlined_call_operand.hbm [shape: f32[1,32], index: 2, kind: input, shape index: {}]   ;;  %s484_s3 = inlined_call_operand.hbm [shape: bf16[4,32,8], index: 3, kind: output, shape index: {}]  }
   0x1   :  { %9 = vsyncpa [#allocation6], 0 }
   0x2   :  { %10 = vsyncpa [#allocation4], 0  ;;  %s372_s12 = smov [#allocation5]   ;;  %s373_s14 = smov [#allocation2]  }
   0x3   :  { %s28_s13 = sshll.u32 %s372_s12, 4  ;;  %s16_s15 = sshll.u32 %s373_s14, 4  ;;  %s29_s13 = int_to_ptr.vmem [resolvable:$true] %s28_s13  ;;  %s401_s15 = int_to_ptr.vmem [resolvable:$true] %s16_s15 }
   0x4   :  { %s278_s18 = scalar_lea.hbm %s482_s1, 256 }
   0x5   :  { %p279_p0 = scmp.ne.s32.totalorder %s482_s1, %s278_s18  ;;  %p282_p1 = scmp.lt.u32.totalorder %s278_s18, %s482_s1 }
   0x7   :  { %p284_p2 = pnand %p282_p1, %p279_p0 }
   0x9   :  { %287 = shalt.err (!%p284_p2)
}
   0xa   :  { %s288_s23 = scalar_lea.vmem %s29_s13, 256  ;;  %p293_p4 = scmp.lt.s32.totalorder %s29_s13, %s29_s13 }
   0xb   :  { %p289_p3 = scmp.ne.s32.totalorder %s29_s13, %s288_s23  ;;  %p294_p5 = scmp.lt.s32.totalorder %s288_s23, %s288_s23 }
   0xd   :  { %p295_p6 = por %p294_p5, %p293_p4 }
   0xf   :  { %p296_p7 = pnand %p295_p6, %p289_p3 }
  0x11   :  { %299 = shalt.err (!%p296_p7)
}
  0x12   :  { %s374_s24 = smov 64   ;;  %s375_s25 = smov 4  }
  0x13   :  { %34 = dma.hbm_to_vmem [thread:$0]  %s482_s1, 256, %s29_s13, [#allocation6], %s374_s24, %s374_s24, %s375_s25  }
  0x14   :  { %s300_s30 = scalar_lea.hbm %s481_s0, 256 }
  0x15   :  { %p301_p8 = scmp.ne.s32.totalorder %s481_s0, %s300_s30  ;;  %p304_p9 = scmp.lt.u32.totalorder %s300_s30, %s481_s0 }
  0x17   :  { %p306_p10 = pnand %p304_p9, %p301_p8 }
  0x19   :  { %309 = shalt.err (!%p306_p10)
}
  0x1a   :  { %s310_s8 = scalar_lea.vmem %s401_s15, 256  ;;  %p315_p12 = scmp.lt.s32.totalorder %s401_s15, %s401_s15 }
  0x1b   :  { %p311_p11 = scmp.ne.s32.totalorder %s401_s15, %s310_s8  ;;  %p316_p13 = scmp.lt.s32.totalorder %s310_s8, %s310_s8 }
  0x1d   :  { %p317_p0 = por %p316_p13, %p315_p12 }
  0x1f   :  { %p318_p1 = pnand %p317_p0, %p311_p11 }
  0x21   :  { %321 = shalt.err (!%p318_p1)
}
  0x22   :  { %22 = dma.hbm_to_vmem [thread:$0]  %s481_s0, 256, %s401_s15, [#allocation3], %s374_s24, %s374_s24, %s375_s25  }
  0x23   :  { %s376_s10 = smov [#allocation7]   ;;  %s322_s14 = scalar_lea.hbm %s483_s2, 16 }
  0x24   :  { %s41_s11 = sshll.u32 %s376_s10, 4  ;;  %p323_p2 = scmp.ne.s32.totalorder %s483_s2, %s322_s14  ;;  %s42_s11 = int_to_ptr.vmem [resolvable:$true] %s41_s11 }
  0x25   :  { %p326_p3 = scmp.lt.u32.totalorder %s322_s14, %s483_s2 }
  0x27   :  { %p328_p4 = pnand %p326_p3, %p323_p2 }
  0x29   :  { %331 = shalt.err (!%p328_p4)
}
  0x2a   :  { %s332_s20 = scalar_lea.vmem %s42_s11, 16  ;;  %s336_s0 = scalar_lea.vmem %s42_s11, 32 }
  0x2b   :  { %p333_p5 = scmp.ne.s32.totalorder %s42_s11, %s332_s20  ;;  %p337_p6 = scmp.lt.s32.totalorder %s42_s11, %s42_s11 }
  0x2c   :  { %p338_p7 = scmp.lt.s32.totalorder %s336_s0, %s332_s20 }
  0x2e   :  { %p339_p8 = por %p338_p7, %p337_p6 }
  0x30   :  { %p340_p9 = pnand %p339_p8, %p333_p5 }
  0x32   :  { %343 = shalt.err (!%p340_p9)
}
  0x33   :  { %44 = dma.hbm_to_vmem [thread:$0]  %s483_s2, 16, %s42_s11, [#allocation6]  }
  0x34   :  { %366 = dma.done.wait [#allocation3], 256  }
  0x35   :  { %367 = vsyncadd [#allocation3], 4294967040 }
  0x36   :  { %368 = dma.done.wait [#allocation6], 272  }
  0x37   :  { %369 = vsyncadd [#allocation6], 4294967024  ;;  %v274_v0 = vld [vmem:[#allocation5] sm:$0xff]   ;;  %v275_v1 = vld [vmem:[#allocation5 + $0x8] sm:$0xff]   ;;  %vm92_vm0 = vcmask 261120   ;;  %vm164_vm1 = vcmask 60416  }
  0x38   :  { %257 = vmatprep.subr.bf16.mxu0 %v274_v0  ;;  %v276_v2 = vld [vmem:[#allocation2] sm:$0xff]   ;;  %v277_v3 = vld [vmem:[#allocation2 + $0x8] sm:$0xff]   ;;  %s377_s2 = smov 112   ;;  %s378_s22 = smov 120  }
  0x39   :  { %258 = vmatpush3.bf16.msra.mxu0 %v274_v0  ;;  %261 = vmatprep.mubr.msk.bf16.mxu0 %vm92_vm0, %v276_v2  ;;  %v238_v4 = vld [vmem:[#allocation7] ss:$0 sm:$0xff]  ;;  %s379_s23 = smov 104   ;;  %s380_s26 = smov [#allocation8]  }
  0x3a   :  { %259 = vmatprep.subr.bf16.mxu0 %v275_v1  ;;  %s225_s27 = sshll.u32 %s380_s26, 4  ;;  %s226_s27 = int_to_ptr.vmem [resolvable:$true] %s225_s27 }
  0x3b   :  { %s344_s28 = scalar_lea.vmem %s226_s27, 1024  ;;  %p349_p11 = scmp.lt.s32.totalorder %s226_s27, %s226_s27 }
  0x3c   :  { %p345_p10 = scmp.ne.s32.totalorder %s226_s27, %s344_s28  ;;  %p350_p12 = scmp.lt.s32.totalorder %s344_s28, %s344_s28 }
  0x3d   :  { %260 = vmatpush3.bf16.msra.mxu0 %v275_v1 }
  0x3e   :  { %p351_p13 = por %p350_p12, %p349_p11 }
  0x40   :  { %262 = vmatmul.mubr.msk.bf16.vlgmr.msra.gmra.mrb[0].mxu0 %vm92_vm0, %v277_v3  ;;  %p352_p0 = pnand %p351_p13, %p345_p10 }
 0x113   :  { %v263_v5 = vpop.f32.mrb[0].mxu0 }
 0x114   :  { %v142_v6 = vadd.f32 %v263_v5, %v238_v4  ;;  %v133_v7 = vpop.f32.mrb[1].mxu0 }
 0x115   :  { %v134_v8 = vadd.f32 %v238_v4, %v133_v7  ;;  %v264_v9 = vpop.f32.mrb[2].mxu0 }
 0x116   :  { %v251_v10 = vpack.c.bf16 %v142_v6, %v142_v6  ;;  %v145_v11 = vadd.f32 %v264_v9, %v238_v4  ;;  %v136_v12 = vpop.f32.mrb[3].mxu0 }
 0x117   :  { %v249_v13 = vpack.c.bf16 %v134_v8, %v134_v8  ;;  %v137_v14 = vadd.f32 %v238_v4, %v136_v12 }
 0x118   :  { %167 = vst.msk [vmem:[#allocation8 + $0x8] sm:$0xf] %vm164_vm1, %v251_v10  ;;  %v252_v15 = vpack.c.bf16 %v145_v11, %v145_v11  ;;  %190 = vrot.lane.b32.xlu0 %v251_v10, %s377_s2  ;;  %173 = vrot.lane.b32.xlu1 %v251_v10, %s378_s22 }
 0x119   :  { %165 = vst.msk [vmem:[#allocation8] sm:$0xf] %vm164_vm1, %v249_v13  ;;  %v250_v16 = vpack.c.bf16 %v137_v14, %v137_v14 }
 0x11a   :  { %168 = vst.msk [vmem:[#allocation8 + $0xc] sm:$0xf] %vm164_vm1, %v252_v15 }
 0x11b   :  { %166 = vst.msk [vmem:[#allocation8 + $0x4] sm:$0xf] %vm164_vm1, %v250_v16 }
 0x11c   :  { %175 = vrot.lane.b32.xlu1 %v252_v15, %s378_s22  ;;  %169 = vrot.lane.b32.xlu0 %v249_v13, %s378_s22 }
 0x120   :  { %192 = vrot.lane.b32.xlu1 %v252_v15, %s377_s2  ;;  %186 = vrot.lane.b32.xlu0 %v249_v13, %s377_s2 }
 0x124   :  { %188 = vrot.lane.b32.xlu1 %v250_v16, %s377_s2  ;;  %203 = vrot.lane.b32.xlu0 %v249_v13, %s379_s23 }
 0x128   :  { %205 = vrot.lane.b32.xlu1 %v250_v16, %s379_s23  ;;  %171 = vrot.lane.b32.xlu0 %v250_v16, %s378_s22 }
 0x12c   :  { %209 = vrot.lane.b32.xlu1 %v252_v15, %s379_s23  ;;  %207 = vrot.lane.b32.xlu0 %v251_v10, %s379_s23 }
 0x18a   :  { %v191_v17 = vpop.permute.xlu0 %190  ;;  %v174_v18 = vpop.permute.xlu1 %173 }
 0x18b   :  { %201 = vst.msk [vmem:[#allocation8 + $0x28] sm:$0xf] %vm164_vm1, %v191_v17  ;;  %184 = vst.msk [vmem:[#allocation8 + $0x18] sm:$0xf] %vm164_vm1, %v174_v18 }
 0x18e   :  { %v176_v19 = vpop.permute.xlu1 %175  ;;  %v170_v20 = vpop.permute.xlu0 %169 }
 0x18f   :  { %185 = vst.msk [vmem:[#allocation8 + $0x1c] sm:$0xf] %vm164_vm1, %v176_v19  ;;  %182 = vst.msk [vmem:[#allocation8 + $0x10] sm:$0xf] %vm164_vm1, %v170_v20 }
 0x192   :  { %v193_v21 = vpop.permute.xlu1 %192  ;;  %v187_v22 = vpop.permute.xlu0 %186 }
 0x193   :  { %202 = vst.msk [vmem:[#allocation8 + $0x2c] sm:$0xf] %vm164_vm1, %v193_v21  ;;  %199 = vst.msk [vmem:[#allocation8 + $0x20] sm:$0xf] %vm164_vm1, %v187_v22 }
 0x196   :  { %v189_v23 = vpop.permute.xlu1 %188  ;;  %v204_v24 = vpop.permute.xlu0 %203 }
 0x197   :  { %200 = vst.msk [vmem:[#allocation8 + $0x24] sm:$0xf] %vm164_vm1, %v189_v23  ;;  %216 = vst.msk [vmem:[#allocation8 + $0x30] sm:$0xf] %vm164_vm1, %v204_v24 }
 0x19a   :  { %v206_v25 = vpop.permute.xlu1 %205  ;;  %v172_v26 = vpop.permute.xlu0 %171 }
 0x19b   :  { %217 = vst.msk [vmem:[#allocation8 + $0x34] sm:$0xf] %vm164_vm1, %v206_v25  ;;  %183 = vst.msk [vmem:[#allocation8 + $0x14] sm:$0xf] %vm164_vm1, %v172_v26 }
 0x19e   :  { %v210_v27 = vpop.permute.xlu1 %209  ;;  %v208_v28 = vpop.permute.xlu0 %207 }
 0x19f   :  { %219 = vst.msk [vmem:[#allocation8 + $0x3c] sm:$0xf] %vm164_vm1, %v210_v27  ;;  %218 = vst.msk [vmem:[#allocation8 + $0x38] sm:$0xf] %vm164_vm1, %v208_v28 }
 0x1a0   :  { %355 = shalt.err (!%p352_p0)
}
 0x1a1   :  { %s356_s4 = scalar_lea.hbm %s484_s3, 1024 }
 0x1a2   :  { %p357_p1 = scmp.ne.s32.totalorder %s484_s3, %s356_s4  ;;  %p360_p2 = scmp.lt.u32.totalorder %s356_s4, %s484_s3 }
 0x1a4   :  { %p362_p3 = pnand %p360_p2, %p357_p1 }
 0x1a6   :  { %365 = shalt.err (!%p362_p3)
}
 0x1a7   :  { %231 = dma.vmem_to_hbm [thread:$0]  %s226_s27, 1024, %s484_s3, [#allocation4], %s374_s24, %s374_s24, %s375_s25  }
 0x1a8   :  { %370 = dma.done.wait [#allocation4], 1024  }
 0x1a9   :  { %371 = vsyncadd [#allocation4], 4294966272 }
 0x1aa   :  { %235 = vsyncpa [#allocation3], 1 }
 0x1ab   :  { %236 = vsyncpa [#allocation6], 1 }
 0x1ac   :  { %237 = vsyncpa [#allocation4], 1 }

// kernel: tpu_custom_call.1
= control target key start
LH: loop header
LB: loop body
LE: loop exit
PB: predicated region body
PF: predicated region fallthrough
CT: control target
= control target key end

     0   :  { %8 = vsyncpa [#allocation3], 0  ;;  %s481_s0 = inlined_call_operand.hbm [shape: bf16[32,32], index: 0, kind: input, shape index: {}]   ;;  %s482_s1 = inlined_call_operand.hbm [shape: bf16[32,32], index: 1, kind: input, shape index: {}]   ;;  %s483_s2 = inlined_call_operand.hbm [shape: f32[1,32], index: 2, kind: input, shape index: {}]   ;;  %s484_s3 = inlined_call_operand.hbm [shape: bf16[4,32,8], index: 3, kind: output, shape index: {}]  }
   0x1   :  { %9 = vsyncpa [#allocation6], 0 }
   0x2   :  { %10 = vsyncpa [#allocation4], 0  ;;  %s372_s12 = smov [#allocation5]   ;;  %s373_s14 = smov [#allocation2]  }
   0x3   :  { %s28_s13 = sshll.u32 %s372_s12, 4  ;;  %s16_s15 = sshll.u32 %s373_s14, 4  ;;  %s29_s13 = int_to_ptr.vmem [resolvable:$true] %s28_s13  ;;  %s401_s15 = int_to_ptr.vmem [resolvable:$true] %s16_s15 }
   0x4   :  { %s278_s18 = scalar_lea.hbm %s482_s1, 256 }
   0x5   :  { %p279_p0 = scmp.ne.s32.totalorder %s482_s1, %s278_s18  ;;  %p282_p1 = scmp.lt.u32.totalorder %s278_s18, %s482_s1 }
   0x7   :  { %p284_p2 = pnand %p282_p1, %p279_p0 }
   0x9   :  { %287 = shalt.err (!%p284_p2)
}
   0xa   :  { %s288_s23 = scalar_lea.vmem %s29_s13, 256  ;;  %p293_p4 = scmp.lt.s32.totalorder %s29_s13, %s29_s13 }
   0xb   :  { %p289_p3 = scmp.ne.s32.totalorder %s29_s13, %s288_s23  ;;  %p294_p5 = scmp.lt.s32.totalorder %s288_s23, %s288_s23 }
   0xd   :  { %p295_p6 = por %p294_p5, %p293_p4 }
   0xf   :  { %p296_p7 = pnand %p295_p6, %p289_p3 }
  0x11   :  { %299 = shalt.err (!%p296_p7)
}
  0x12   :  { %s374_s24 = smov 64   ;;  %s375_s25 = smov 4  }
  0x13   :  { %34 = dma.hbm_to_vmem [thread:$0]  %s482_s1, 256, %s29_s13, [#allocation6], %s374_s24, %s374_s24, %s375_s25  }
  0x14   :  { %s300_s30 = scalar_lea.hbm %s481_s0, 256 }
  0x15   :  { %p301_p8 = scmp.ne.s32.totalorder %s481_s0, %s300_s30  ;;  %p304_p9 = scmp.lt.u32.totalorder %s300_s30, %s481_s0 }
  0x17   :  { %p306_p10 = pnand %p304_p9, %p301_p8 }
  0x19   :  { %309 = shalt.err (!%p306_p10)
}
  0x1a   :  { %s310_s8 = scalar_lea.vmem %s401_s15, 256  ;;  %p315_p12 = scmp.lt.s32.totalorder %s401_s15, %s401_s15 }
  0x1b   :  { %p311_p11 = scmp.ne.s32.totalorder %s401_s15, %s310_s8  ;;  %p316_p13 = scmp.lt.s32.totalorder %s310_s8, %s310_s8 }
  0x1d   :  { %p317_p0 = por %p316_p13, %p315_p12 }
  0x1f   :  { %p318_p1 = pnand %p317_p0, %p311_p11 }
  0x21   :  { %321 = shalt.err (!%p318_p1)
}
  0x22   :  { %22 = dma.hbm_to_vmem [thread:$0]  %s481_s0, 256, %s401_s15, [#allocation3], %s374_s24, %s374_s24, %s375_s25  }
  0x23   :  { %s376_s10 = smov [#allocation7]   ;;  %s322_s14 = scalar_lea.hbm %s483_s2, 16 }
  0x24   :  { %s41_s11 = sshll.u32 %s376_s10, 4  ;;  %p323_p2 = scmp.ne.s32.totalorder %s483_s2, %s322_s14  ;;  %s42_s11 = int_to_ptr.vmem [resolvable:$true] %s41_s11 }
  0x25   :  { %p326_p3 = scmp.lt.u32.totalorder %s322_s14, %s483_s2 }
  0x27   :  { %p328_p4 = pnand %p326_p3, %p323_p2 }
  0x29   :  { %331 = shalt.err (!%p328_p4)
}
  0x2a   :  { %s332_s20 = scalar_lea.vmem %s42_s11, 16  ;;  %s336_s0 = scalar_lea.vmem %s42_s11, 32 }
  0x2b   :  { %p333_p5 = scmp.ne.s32.totalorder %s42_s11, %s332_s20  ;;  %p337_p6 = scmp.lt.s32.totalorder %s42_s11, %s42_s11 }
  0x2c   :  { %p338_p7 = scmp.lt.s32.totalorder %s336_s0, %s332_s20 }
  0x2e   :  { %p339_p8 = por %p338_p7, %p337_p6 }
  0x30   :  { %p340_p9 = pnand %p339_p8, %p333_p5 }
  0x32   :  { %343 = shalt.err (!%p340_p9)
}
  0x33   :  { %44 = dma.hbm_to_vmem [thread:$0]  %s483_s2, 16, %s42_s11, [#allocation6]  }
  0x34   :  { %366 = dma.done.wait [#allocation3], 256  }
  0x35   :  { %367 = vsyncadd [#allocation3], 4294967040 }
  0x36   :  { %368 = dma.done.wait [#allocation6], 272  }
  0x37   :  { %369 = vsyncadd [#allocation6], 4294967024  ;;  %v274_v0 = vld [vmem:[#allocation5] sm:$0xff]   ;;  %v275_v1 = vld [vmem:[#allocation5 + $0x8] sm:$0xff]   ;;  %vm92_vm0 = vcmask 261120   ;;  %vm164_vm1 = vcmask 60416  }
  0x38   :  { %257 = vmatprep.subr.bf16.mxu0 %v274_v0  ;;  %v276_v2 = vld [vmem:[#allocation2] sm:$0xff]   ;;  %v277_v3 = vld [vmem:[#allocation2 + $0x8] sm:$0xff]   ;;  %s377_s2 = smov 112   ;;  %s378_s22 = smov 120  }
  0x39   :  { %258 = vmatpush3.bf16.msra.mxu0 %v274_v0  ;;  %261 = vmatprep.mubr.msk.bf16.mxu0 %vm92_vm0, %v276_v2  ;;  %v238_v4 = vld [vmem:[#allocation7] ss:$0 sm:$0xff]  ;;  %s379_s23 = smov 104   ;;  %s380_s26 = smov [#allocation8]  }
  0x3a   :  { %259 = vmatprep.subr.bf16.mxu0 %v275_v1  ;;  %s225_s27 = sshll.u32 %s380_s26, 4  ;;  %s226_s27 = int_to_ptr.vmem [resolvable:$true] %s225_s27 }
  0x3b   :  { %s344_s28 = scalar_lea.vmem %s226_s27, 1024  ;;  %p349_p11 = scmp.lt.s32.totalorder %s226_s27, %s226_s27 }
  0x3c   :  { %p345_p10 = scmp.ne.s32.totalorder %s226_s27, %s344_s28  ;;  %p350_p12 = scmp.lt.s32.totalorder %s344_s28, %s344_s28 }
  0x3d   :  { %260 = vmatpush3.bf16.msra.mxu0 %v275_v1 }
  0x3e   :  { %p351_p13 = por %p350_p12, %p349_p11 }
  0x40   :  { %262 = vmatmul.mubr.msk.bf16.vlgmr.msra.gmra.mrb[0].mxu0 %vm92_vm0, %v277_v3  ;;  %p352_p0 = pnand %p351_p13, %p345_p10 }
 0x113   :  { %v263_v5 = vpop.f32.mrb[0].mxu0 }
 0x114   :  { %v142_v6 = vadd.f32 %v263_v5, %v238_v4  ;;  %v133_v7 = vpop.f32.mrb[1].mxu0 }
 0x115   :  { %v134_v8 = vadd.f32 %v238_v4, %v133_v7  ;;  %v264_v9 = vpop.f32.mrb[2].mxu0 }
 0x116   :  { %v251_v10 = vpack.c.bf16 %v142_v6, %v142_v6  ;;  %v145_v11 = vadd.f32 %v264_v9, %v238_v4  ;;  %v136_v12 = vpop.f32.mrb[3].mxu0 }
 0x117   :  { %v249_v13 = vpack.c.bf16 %v134_v8, %v134_v8  ;;  %v137_v14 = vadd.f32 %v238_v4, %v136_v12 }
 0x118   :  { %167 = vst.msk [vmem:[#allocation8 + $0x8] sm:$0xf] %vm164_vm1, %v251_v10  ;;  %v252_v15 = vpack.c.bf16 %v145_v11, %v145_v11  ;;  %190 = vrot.lane.b32.xlu0 %v251_v10, %s377_s2  ;;  %173 = vrot.lane.b32.xlu1 %v251_v10, %s378_s22 }
 0x119   :  { %165 = vst.msk [vmem:[#allocation8] sm:$0xf] %vm164_vm1, %v249_v13  ;;  %v250_v16 = vpack.c.bf16 %v137_v14, %v137_v14 }
 0x11a   :  { %168 = vst.msk [vmem:[#allocation8 + $0xc] sm:$0xf] %vm164_vm1, %v252_v15 }
 0x11b   :  { %166 = vst.msk [vmem:[#allocation8 + $0x4] sm:$0xf] %vm164_vm1, %v250_v16 }
 0x11c   :  { %175 = vrot.lane.b32.xlu1 %v252_v15, %s378_s22  ;;  %169 = vrot.lane.b32.xlu0 %v249_v13, %s378_s22 }
 0x120   :  { %192 = vrot.lane.b32.xlu1 %v252_v15, %s377_s2  ;;  %186 = vrot.lane.b32.xlu0 %v249_v13, %s377_s2 }
 0x124   :  { %188 = vrot.lane.b32.xlu1 %v250_v16, %s377_s2  ;;  %203 = vrot.lane.b32.xlu0 %v249_v13, %s379_s23 }
 0x128   :  { %205 = vrot.lane.b32.xlu1 %v250_v16, %s379_s23  ;;  %171 = vrot.lane.b32.xlu0 %v250_v16, %s378_s22 }
 0x12c   :  { %209 = vrot.lane.b32.xlu1 %v252_v15, %s379_s23  ;;  %207 = vrot.lane.b32.xlu0 %v251_v10, %s379_s23 }
 0x18a   :  { %v191_v17 = vpop.permute.xlu0 %190  ;;  %v174_v18 = vpop.permute.xlu1 %173 }
 0x18b   :  { %201 = vst.msk [vmem:[#allocation8 + $0x28] sm:$0xf] %vm164_vm1, %v191_v17  ;;  %184 = vst.msk [vmem:[#allocation8 + $0x18] sm:$0xf] %vm164_vm1, %v174_v18 }
 0x18e   :  { %v176_v19 = vpop.permute.xlu1 %175  ;;  %v170_v20 = vpop.permute.xlu0 %169 }
 0x18f   :  { %185 = vst.msk [vmem:[#allocation8 + $0x1c] sm:$0xf] %vm164_vm1, %v176_v19  ;;  %182 = vst.msk [vmem:[#allocation8 + $0x10] sm:$0xf] %vm164_vm1, %v170_v20 }
 0x192   :  { %v193_v21 = vpop.permute.xlu1 %192  ;;  %v187_v22 = vpop.permute.xlu0 %186 }
 0x193   :  { %202 = vst.msk [vmem:[#allocation8 + $0x2c] sm:$0xf] %vm164_vm1, %v193_v21  ;;  %199 = vst.msk [vmem:[#allocation8 + $0x20] sm:$0xf] %vm164_vm1, %v187_v22 }
 0x196   :  { %v189_v23 = vpop.permute.xlu1 %188  ;;  %v204_v24 = vpop.permute.xlu0 %203 }
 0x197   :  { %200 = vst.msk [vmem:[#allocation8 + $0x24] sm:$0xf] %vm164_vm1, %v189_v23  ;;  %216 = vst.msk [vmem:[#allocation8 + $0x30] sm:$0xf] %vm164_vm1, %v204_v24 }
 0x19a   :  { %v206_v25 = vpop.permute.xlu1 %205  ;;  %v172_v26 = vpop.permute.xlu0 %171 }
 0x19b   :  { %217 = vst.msk [vmem:[#allocation8 + $0x34] sm:$0xf] %vm164_vm1, %v206_v25  ;;  %183 = vst.msk [vmem:[#allocation8 + $0x14] sm:$0xf] %vm164_vm1, %v172_v26 }
 0x19e   :  { %v210_v27 = vpop.permute.xlu1 %209  ;;  %v208_v28 = vpop.permute.xlu0 %207 }
 0x19f   :  { %219 = vst.msk [vmem:[#allocation8 + $0x3c] sm:$0xf] %vm164_vm1, %v210_v27  ;;  %218 = vst.msk [vmem:[#allocation8 + $0x38] sm:$0xf] %vm164_vm1, %v208_v28 }
 0x1a0   :  { %355 = shalt.err (!%p352_p0)
}
 0x1a1   :  { %s356_s4 = scalar_lea.hbm %s484_s3, 1024 }
 0x1a2   :  { %p357_p1 = scmp.ne.s32.totalorder %s484_s3, %s356_s4  ;;  %p360_p2 = scmp.lt.u32.totalorder %s356_s4, %s484_s3 }
 0x1a4   :  { %p362_p3 = pnand %p360_p2, %p357_p1 }
 0x1a6   :  { %365 = shalt.err (!%p362_p3)
}
 0x1a7   :  { %231 = dma.vmem_to_hbm [thread:$0]  %s226_s27, 1024, %s484_s3, [#allocation4], %s374_s24, %s374_s24, %s375_s25  }
 0x1a8   :  { %370 = dma.done.wait [#allocation4], 1024  }
 0x1a9   :  { %371 = vsyncadd [#allocation4], 4294966272 }
 0x1aa   :  { %235 = vsyncpa [#allocation3], 1 }
 0x1ab   :  { %236 = vsyncpa [#allocation6], 1 }
 0x1ac   :  { %237 = vsyncpa [#allocation4], 1 }

</bundles_post_ra>
